<compile_context>
chip_gen: v6e
topology: v6e:2x2x1
jax: 0.10.0
libtpu: 0.0.40
codegen_flags: <defaults>
</compile_context>

<pallas_src>
import functools

import jax
import jax.numpy as jnp
from jax.experimental import pallas as pl
from jax.experimental.pallas import tpu as pltpu

_LANE_CHOICES = (512, 256, 128)   # lane-dense widths (multiples of 128)


def _vae_loss_kernel(recon_ref, x_ref, mu_ref, logvar_ref,
                     loss_ref, kld_ref, acc_ref,
                     *, beta, n_valid, n_rec, n_lat, lanes):
    step = pl.program_id(0)
    tm = recon_ref.shape[0]

    @pl.when(step == 0)
    def _():
        acc_ref[...] = jnp.zeros_like(acc_ref)

    # ---- reconstruction BCE partial (PyTorch clamps log terms at -100) ----
    p = recon_ref[...].astype(jnp.float32)
    x = x_ref[...].astype(jnp.float32)
    log_p = jnp.maximum(jnp.log(p), -100.0)
    log_1mp = jnp.maximum(jnp.log1p(-p), -100.0)   # log1p for parity near p~1
    bce = -(x * log_p + (1.0 - x) * log_1mp)

    # Tail / OOB mask on the GLOBAL element index.  Applied AFTER the log math
    # so garbage rows (past the array end) never reach the accumulator.
    row = jax.lax.broadcasted_iota(jnp.int32, (tm, lanes), 0) + step * tm
    col = jax.lax.broadcasted_iota(jnp.int32, (tm, lanes), 1)
    elem = row * lanes + col
    bce = jnp.where(elem < n_valid, bce, 0.0)

    # Fold (tm, L) into the fixed (8, L) accumulator: the reshape splits rows
    # exactly at sublane-tile boundaries (free), the sum over axis 0 is
    # sequential VALU adds (no XLU), hidden under the streaming DMA.
    acc_ref[...] += bce.reshape(tm // 8, 8, lanes).sum(axis=0)

    # ---- epilogue: one small XLU reduce, KL once, scalar writes ----
    @pl.when(step == pl.num_programs(0) - 1)
    def _():
        recon_loss = jnp.sum(acc_ref[...]) * (1.0 / n_rec)
        mu = mu_ref[...].astype(jnp.float32)
        lv = logvar_ref[...].astype(jnp.float32)
        kl_terms = 1.0 + lv - mu * mu - jnp.exp(lv)
        kld = -0.5 * (jnp.sum(kl_terms) * (1.0 / n_lat))
        loss_ref[0, 0] = recon_loss + beta * kld
        kld_ref[0, 0] = kld


def _vmem_capacity_bytes():
    try:
        return int(pltpu.get_tpu_info().vmem_capacity_bytes)
    except Exception:
        return 128 << 20   # v5e/v6e default


def _pick_lanes(n):
    for lanes in _LANE_CHOICES:
        if n % lanes == 0:
            return lanes, 0
    # Fallback: element count not a multiple of 128 -> minimal pad (forces one
    # HBM copy).  All realistic VAE image sizes take the copy-free path above.
    lanes = 128
    return lanes, (-n) % lanes


def vae_loss(recon_x, x, mu, logvar, variational_beta, *, max_step_bytes=None):
    """Returns (total_loss, kldivergence) as float32 scalars.

    Matches F.binary_cross_entropy(recon.view(B,-1), x.view(B,-1), 'mean')
    + beta * (-0.5 * mean(1 + logvar - mu^2 - exp(logvar))).
    """
    n = int(recon_x.size)
    n_lat = float(mu.size)
    lanes, pad = _pick_lanes(n)

    recon_flat = recon_x.reshape(-1)
    x_flat = x.reshape(-1)
    if pad:
        # Value is irrelevant (masked in-kernel); ones keep the logs finite.
        recon_flat = jnp.concatenate(
            [recon_flat, jnp.ones((pad,), recon_flat.dtype)])
        x_flat = jnp.concatenate([x_flat, jnp.ones((pad,), x_flat.dtype)])
    rows = (n + pad) // lanes
    recon2d = recon_flat.reshape(rows, lanes)   # free row-major reshape
    x2d = x_flat.reshape(rows, lanes)
    mu2 = mu.reshape(mu.shape[0], -1)
    lv2 = logvar.reshape(logvar.shape[0], -1)

    # ---- generation-aware streaming tile ------------------------------------
    vmem_cap = _vmem_capacity_bytes()
    if max_step_bytes is not None:
        step_bytes = int(max_step_bytes)
    elif vmem_cap <= (64 << 20):     # v7x: 64 MiB/TC but ~3.2 TB/s HBM
        step_bytes = 8 << 20
    else:                            # v5e / v6e (128 MiB VMEM)
        step_bytes = 4 << 20
    itembytes = recon2d.dtype.itemsize + x2d.dtype.itemsize   # both streams
    # Sublane alignment: 8 rows for 32-bit, 16 for bf16, 32 for 8-bit inputs.
    pack = max(1, 4 // min(recon2d.dtype.itemsize, x2d.dtype.itemsize))
    sub = 8 * pack
    max_tm = max(sub, (step_bytes // (lanes * itembytes)) // sub * sub)
    tm = int(min(max_tm, pl.cdiv(rows, sub) * sub))
    grid = (pl.cdiv(rows, tm),)

    tile_bytes = tm * lanes * itembytes
    vmem_budget = 2 * tile_bytes + 8 * lanes * 4 + (3 << 20)
    vmem_limit = int(min(max(vmem_budget, 4 << 20), vmem_cap - (8 << 20)))

    kernel = functools.partial(
        _vae_loss_kernel,
        beta=float(variational_beta),
        n_valid=int(n),
        n_rec=float(n),
        n_lat=n_lat,
        lanes=int(lanes),
    )

    cost = pl.CostEstimate(
        flops=6 * n + 8 * int(mu.size),
        transcendentals=2 * n + int(mu.size),
        bytes_accessed=int(recon_x.size) * recon_x.dtype.itemsize
        + int(x.size) * x.dtype.itemsize
        + int(mu.size) * mu.dtype.itemsize
        + int(logvar.size) * logvar.dtype.itemsize + 8,
    )

    out_shapes = (
        jax.ShapeDtypeStruct((1, 1), jnp.float32),  # total loss
        jax.ShapeDtypeStruct((1, 1), jnp.float32),  # kld
    )

    loss, kld = pl.pallas_call(
        kernel,
        out_shape=out_shapes,
        grid=grid,
        in_specs=[
            pl.BlockSpec((tm, lanes), lambda i: (i, 0)),        # recon tile
            pl.BlockSpec((tm, lanes), lambda i: (i, 0)),        # x tile
            pl.BlockSpec(mu2.shape, lambda i: (0, 0)),          # mu (resident)
            pl.BlockSpec(lv2.shape, lambda i: (0, 0)),          # logvar (resident)
        ],
        out_specs=(
            pl.BlockSpec((1, 1), lambda i: (0, 0), memory_space=pltpu.SMEM),
            pl.BlockSpec((1, 1), lambda i: (0, 0), memory_space=pltpu.SMEM),
        ),
        scratch_shapes=[pltpu.VMEM((8, lanes), jnp.float32)],   # fixed accumulator
        compiler_params=pltpu.CompilerParams(
            dimension_semantics=("arbitrary",),   # reduction axis w/ accumulator
            vmem_limit_bytes=vmem_limit,
        ),
        cost_estimate=cost,
    )(recon2d, x2d, mu2, lv2)

    return loss[0, 0], kld[0, 0]


def _reference(recon_x, x, mu, logvar, beta):
    b = recon_x.shape[0]
    rf = recon_x.reshape(b, -1).astype(jnp.float32)
    xf = x.reshape(b, -1).astype(jnp.float32)
    bce = jnp.mean(-(xf * jnp.maximum(jnp.log(rf), -100.0)
                     + (1.0 - xf) * jnp.maximum(jnp.log1p(-rf), -100.0)))
    mu = mu.astype(jnp.float32)
    lv = logvar.astype(jnp.float32)
    kld = -0.5 * jnp.mean(1.0 + lv - mu ** 2 - jnp.exp(lv))
    return bce + beta * kld, kld


def _check(got, want, rtol=1e-5, atol=1e-5):
    assert jnp.allclose(got[0], want[0], rtol=rtol, atol=atol), (got[0], want[0])
    assert jnp.allclose(got[1], want[1], rtol=rtol, atol=atol), (got[1], want[1])


if __name__ == "__main__":
    key = jax.random.PRNGKey(0)
    Z = 32

    # --- A: small shape consistent with the module (single grid step) ---
    k1, k2, k3, k4 = jax.random.split(key, 4)
    B, C, H, W = 2, 4, 16, 16
    recon_x = jax.nn.sigmoid(jax.random.normal(k1, (B, C, H, W), jnp.float32))
    x = jax.random.uniform(k2, (B, C, H, W), jnp.float32)
    mu = jax.random.normal(k3, (B, Z), jnp.float32)
    logvar = 0.1 * jax.random.normal(k4, (B, Z), jnp.float32)

    out = vae_loss(recon_x, x, mu, logvar, 1.0)
    jax.block_until_ready(out)
    _check(out, _reference(recon_x, x, mu, logvar, 1.0))

    # --- B: multi-step grid accumulation (small forced step size) ---
    k5, k6, k7, k8 = jax.random.split(jax.random.PRNGKey(1), 4)
    B2, C2, H2, W2 = 4, 4, 128, 128
    recon2 = jax.nn.sigmoid(jax.random.normal(k5, (B2, C2, H2, W2), jnp.float32))
    x2 = jax.random.uniform(k6, (B2, C2, H2, W2), jnp.float32)
    mu2 = jax.random.normal(k7, (B2, Z), jnp.float32)
    lv2 = 0.1 * jax.random.normal(k8, (B2, Z), jnp.float32)
    out2 = vae_loss(recon2, x2, mu2, lv2, 0.5, max_step_bytes=1 << 20)
    jax.block_until_ready(out2)
    _check(out2, _reference(recon2, x2, mu2, lv2, 0.5))

    # --- C: ragged element count (exercises fallback pad + element mask) ---
    k9, k10, k11, k12 = jax.random.split(jax.random.PRNGKey(2), 4)
    recon3 = jax.nn.sigmoid(jax.random.normal(k9, (2, 3, 10, 10), jnp.float32))
    x3 = jax.random.uniform(k10, (2, 3, 10, 10), jnp.float32)
    mu3 = jax.random.normal(k11, (2, Z), jnp.float32)
    lv3 = 0.1 * jax.random.normal(k12, (2, Z), jnp.float32)
    out3 = vae_loss(recon3, x3, mu3, lv3, 2.0)
    jax.block_until_ready(out3)
    _check(out3, _reference(recon3, x3, mu3, lv3, 2.0))

    # --- D: bf16 inputs stream in native dtype (kernel upcasts on the VPU) ---
    recon4 = recon_x.astype(jnp.bfloat16)
    x4 = x.astype(jnp.bfloat16)
    out4 = vae_loss(recon4, x4, mu, logvar, 1.0)
    jax.block_until_ready(out4)
    _check(out4, _reference(recon4, x4, mu, logvar, 1.0), rtol=1e-4, atol=1e-4)

    print("KERNEL_OK")
</pallas_src>

<mosaic_0001>
module attributes {stable_mosaic.version = 11 : i64} {
  func.func @_vae_loss_kernel(%arg0: i32, %arg1: memref<8x512xf32, #tpu.memory_space<vmem>>, %arg2: memref<8x512xf32, #tpu.memory_space<vmem>>, %arg3: memref<2x32xf32, #tpu.memory_space<vmem>>, %arg4: memref<2x32xf32, #tpu.memory_space<vmem>>, %arg5: memref<1x1xf32, #tpu.memory_space<smem>>, %arg6: memref<1x1xf32, #tpu.memory_space<smem>>, %arg7: memref<8x512xf32, #tpu.memory_space<vmem>>) attributes {dimension_semantics = [#tpu.dimension_semantics<arbitrary>], iteration_bounds = array<i64: 1>, scalar_prefetch = 0 : i64, scratch_operands = 1 : i64, tpu.core_type = #tpu.core_type<tc>, window_params = [{transform_indices = @transform_0, window_bounds = array<i64: 8, 512>}, {transform_indices = @transform_1, window_bounds = array<i64: 8, 512>}, {pipeline_mode = #tpu.pipeline_mode<synchronous>, transform_indices = @transform_2, window_bounds = array<i64: 2, 32>}, {pipeline_mode = #tpu.pipeline_mode<synchronous>, transform_indices = @transform_3, window_bounds = array<i64: 2, 32>}, {transform_indices = @transform_4, window_bounds = array<i64: 1, 1>}, {transform_indices = @transform_5, window_bounds = array<i64: 1, 1>}]} {
    %c0_i32 = arith.constant 0 : i32
    %0 = arith.cmpi eq, %arg0, %c0_i32 : i32
    %1 = arith.extui %0 : i1 to i32
    %c0_i32_0 = arith.constant 0 : i32
    %2 = arith.cmpi ne, %1, %c0_i32_0 : i32
    scf.if %2 {
      %cst_16 = arith.constant 0.000000e+00 : f32
      %40 = vector.broadcast %cst_16 : f32 to vector<8x512xf32>
      %c0_17 = arith.constant 0 : index
      %c0_18 = arith.constant 0 : index
      %41 = vector.load %arg7[%c0_17, %c0_18] : memref<8x512xf32, #tpu.memory_space<vmem>>, vector<8x512xf32>
      tpu.vector_store %arg7[%c0_17, %c0_18], %40 {strides = array<i32>} : memref<8x512xf32, #tpu.memory_space<vmem>>, vector<8x512xf32>,
    } else {
    }
    %c0 = arith.constant 0 : index
    %c0_1 = arith.constant 0 : index
    %3 = vector.load %arg1[%c0, %c0_1] : memref<8x512xf32, #tpu.memory_space<vmem>>, vector<8x512xf32>
    %c0_2 = arith.constant 0 : index
    %c0_3 = arith.constant 0 : index
    %4 = vector.load %arg2[%c0_2, %c0_3] : memref<8x512xf32, #tpu.memory_space<vmem>>, vector<8x512xf32>
    %5 = math.log %3 : vector<8x512xf32>
    %cst = arith.constant -1.000000e+02 : f32
    %6 = vector.broadcast %cst : f32 to vector<8x512xf32>
    %7 = arith.maximumf %5, %6 : vector<8x512xf32>
    %cst_4 = arith.constant 0.000000e+00 : f32
    %8 = vector.broadcast %cst_4 : f32 to vector<8x512xf32>
    %9 = arith.subf %8, %3 : vector<8x512xf32>
    %10 = math.log1p %9 : vector<8x512xf32>
    %cst_5 = arith.constant -1.000000e+02 : f32
    %11 = vector.broadcast %cst_5 : f32 to vector<8x512xf32>
    %12 = arith.maximumf %10, %11 : vector<8x512xf32>
    %13 = arith.mulf %4, %7 : vector<8x512xf32>
    %cst_6 = arith.constant 1.000000e+00 : f32
    %14 = vector.broadcast %cst_6 : f32 to vector<8x512xf32>
    %15 = arith.subf %14, %4 : vector<8x512xf32>
    %16 = arith.mulf %15, %12 : vector<8x512xf32>
    %17 = arith.addf %13, %16 : vector<8x512xf32>
    %cst_7 = arith.constant 0.000000e+00 : f32
    %18 = vector.broadcast %cst_7 : f32 to vector<8x512xf32>
    %19 = arith.subf %18, %17 : vector<8x512xf32>
    %20 = tpu.iota {dimensions = array<i32: 0>} : vector<8x512xi32>
    %c8_i32 = arith.constant 8 : i32
    %21 = arith.muli %arg0, %c8_i32 : i32
    %22 = vector.broadcast %21 : i32 to vector<8x512xi32>
    %23 = arith.addi %20, %22 : vector<8x512xi32>
    %24 = tpu.iota {dimensions = array<i32: 1>} : vector<8x512xi32>
    %c512_i32 = arith.constant 512 : i32
    %25 = vector.broadcast %c512_i32 : i32 to vector<8x512xi32>
    %26 = arith.muli %23, %25 : vector<8x512xi32>
    %27 = arith.addi %26, %24 : vector<8x512xi32>
    %c2048_i32 = arith.constant 2048 : i32
    %28 = vector.broadcast %c2048_i32 : i32 to vector<8x512xi32>
    %29 = arith.cmpi slt, %27, %28 : vector<8x512xi32>
    %cst_8 = arith.constant 0.000000e+00 : f32
    %30 = vector.broadcast %cst_8 : f32 to vector<8x512xf32>
    %31 = arith.select %29, %19, %30 : vector<8x512xi1>, vector<8x512xf32>
    %c0_9 = arith.constant 0 : index
    %c0_10 = arith.constant 0 : index
    %32 = vector.load %arg7[%c0_9, %c0_10] : memref<8x512xf32, #tpu.memory_space<vmem>>, vector<8x512xf32>
    %33 = vector.shape_cast %31 : vector<8x512xf32> to vector<1x8x512xf32>
    %cst_11 = arith.constant dense<0.000000e+00> : vector<8x512xf32>
    %34 = vector.multi_reduction <add>, %33, %cst_11 [0] : vector<1x8x512xf32> to vector<8x512xf32>
    %35 = arith.addf %32, %34 : vector<8x512xf32>
    %c0_12 = arith.constant 0 : index
    %c0_13 = arith.constant 0 : index
    %36 = vector.load %arg7[%c0_12, %c0_13] : memref<8x512xf32, #tpu.memory_space<vmem>>, vector<8x512xf32>
    tpu.vector_store %arg7[%c0_12, %c0_13], %35 {strides = array<i32>} : memref<8x512xf32, #tpu.memory_space<vmem>>, vector<8x512xf32>,
    %c0_i32_14 = arith.constant 0 : i32
    %37 = arith.cmpi eq, %arg0, %c0_i32_14 : i32
    %38 = arith.extui %37 : i1 to i32
    %c0_i32_15 = arith.constant 0 : i32
    %39 = arith.cmpi ne, %38, %c0_i32_15 : i32
    scf.if %39 {
      %c0_16 = arith.constant 0 : index
      %c0_17 = arith.constant 0 : index
      %40 = vector.load %arg7[%c0_16, %c0_17] : memref<8x512xf32, #tpu.memory_space<vmem>>, vector<8x512xf32>
      %41 = vector.shape_cast %40 : vector<8x512xf32> to vector<1x8x512xf32>
      %cst_18 = arith.constant dense<0.000000e+00> : vector<1xf32>
      %42 = vector.multi_reduction <add>, %41, %cst_18 [1, 2] : vector<1x8x512xf32> to vector<1xf32>
      %43 = vector.shape_cast %42 : vector<1xf32> to vector<1x1x1xf32>
      %44 = vector.extract %43[0, 0, 0] : f32 from vector<1x1x1xf32>
      %cst_19 = arith.constant 4.8828125E-4 : f32
      %45 = arith.mulf %44, %cst_19 : f32
      %c0_20 = arith.constant 0 : index
      %c0_21 = arith.constant 0 : index
      %46 = vector.load %arg3[%c0_20, %c0_21] : memref<2x32xf32, #tpu.memory_space<vmem>>, vector<2x32xf32>
      %c0_22 = arith.constant 0 : index
      %c0_23 = arith.constant 0 : index
      %47 = vector.load %arg4[%c0_22, %c0_23] : memref<2x32xf32, #tpu.memory_space<vmem>>, vector<2x32xf32>
      %cst_24 = arith.constant 1.000000e+00 : f32
      %48 = vector.broadcast %cst_24 : f32 to vector<2x32xf32>
      %49 = arith.addf %48, %47 : vector<2x32xf32>
      %50 = arith.mulf %46, %46 : vector<2x32xf32>
      %51 = arith.subf %49, %50 : vector<2x32xf32>
      %52 = math.exp %47 : vector<2x32xf32>
      %53 = arith.subf %51, %52 : vector<2x32xf32>
      %54 = vector.shape_cast %53 : vector<2x32xf32> to vector<1x2x32xf32>
      %cst_25 = arith.constant dense<0.000000e+00> : vector<1xf32>
      %55 = vector.multi_reduction <add>, %54, %cst_25 [1, 2] : vector<1x2x32xf32> to vector<1xf32>
      %56 = vector.shape_cast %55 : vector<1xf32> to vector<1x1x1xf32>
      %57 = vector.extract %56[0, 0, 0] : f32 from vector<1x1x1xf32>
      %cst_26 = arith.constant 1.562500e-02 : f32
      %58 = arith.mulf %57, %cst_26 : f32
      %cst_27 = arith.constant -5.000000e-01 : f32
      %59 = arith.mulf %cst_27, %58 : f32
      %cst_28 = arith.constant 1.000000e+00 : f32
      %60 = arith.mulf %cst_28, %59 : f32
      %61 = arith.addf %45, %60 : f32
      %c0_29 = arith.constant 0 : index
      %c0_30 = arith.constant 0 : index
      %62 = memref.load %arg5[%c0_29, %c0_30] : memref<1x1xf32, #tpu.memory_space<smem>>
      memref.store %61, %arg5[%c0_29, %c0_30] : memref<1x1xf32, #tpu.memory_space<smem>>
      %c0_31 = arith.constant 0 : index
      %c0_32 = arith.constant 0 : index
      %63 = memref.load %arg6[%c0_31, %c0_32] : memref<1x1xf32, #tpu.memory_space<smem>>
      memref.store %59, %arg6[%c0_31, %c0_32] : memref<1x1xf32, #tpu.memory_space<smem>>
    } else {
    }
    return
  }
  func.func @transform_0(%arg0: i32) -> (i32, i32) {
    %c0_i32 = arith.constant 0 : i32
    %c0_i32_0 = arith.constant 0 : i32
    return %arg0, %c0_i32 : i32, i32
  }
  func.func @transform_1(%arg0: i32) -> (i32, i32) {
    %c0_i32 = arith.constant 0 : i32
    %c0_i32_0 = arith.constant 0 : i32
    return %arg0, %c0_i32 : i32, i32
  }
  func.func @transform_2(%arg0: i32) -> (i32, i32) {
    %c0_i32 = arith.constant 0 : i32
    %c0_i32_0 = arith.constant 0 : i32
    %c0_i32_1 = arith.constant 0 : i32
    return %c0_i32, %c0_i32_0 : i32, i32
  }
  func.func @transform_3(%arg0: i32) -> (i32, i32) {
    %c0_i32 = arith.constant 0 : i32
    %c0_i32_0 = arith.constant 0 : i32
    %c0_i32_1 = arith.constant 0 : i32
    return %c0_i32, %c0_i32_0 : i32, i32
  }
  func.func @transform_4(%arg0: i32) -> (i32, i32) {
    %c0_i32 = arith.constant 0 : i32
    %c0_i32_0 = arith.constant 0 : i32
    %c0_i32_1 = arith.constant 0 : i32
    return %c0_i32, %c0_i32_0 : i32, i32
  }
  func.func @transform_5(%arg0: i32) -> (i32, i32) {
    %c0_i32 = arith.constant 0 : i32
    %c0_i32_0 = arith.constant 0 : i32
    %c0_i32_1 = arith.constant 0 : i32
    return %c0_i32, %c0_i32_0 : i32, i32
  }
}

</mosaic_0001>

<bundles_post_ra>
// kernel: tpu_custom_call.1
= control target key start
LH: loop header
LB: loop body
LE: loop exit
PB: predicated region body
PF: predicated region fallthrough
CT: control target
= control target key end

     0   :  { %11 = vsyncpa [#allocation4], 0  ;;  %s454_s0 = inlined_call_operand.hbm [shape: f32[4,512], index: 0, kind: input, shape index: {}]   ;;  %s455_s1 = inlined_call_operand.hbm [shape: f32[4,512], index: 1, kind: input, shape index: {}]   ;;  %s456_s2 = inlined_call_operand.vmem [shape: f32[2,32], index: 2, kind: input, shape index: {}]   ;;  %s457_s3 = inlined_call_operand.vmem [shape: f32[2,32], index: 3, kind: input, shape index: {}]   ;;  %s458_s4 = inlined_call_operand.hbm [shape: f32[1,1], index: 4, kind: output, shape index: {0}]   ;;  %s459_s5 = inlined_call_operand.hbm [shape: f32[1,1], index: 5, kind: output, shape index: {1}]  }
   0x1   :  { %12 = vsyncpa [#allocation7], 0 }
   0x2   :  { %13 = vsyncpa [#allocation5], 0 }
   0x3   :  { %14 = vsyncpa [#allocation10], 0 }
   0x4   :  { %19 = vsyncadd [#allocation4], 256  ;;  %s357_s18 = smov [#allocation3]  }
   0x5   :  { %s20_s19 = sshll.u32 %s357_s18, 4  ;;  %s21_s19 = int_to_ptr.vmem [resolvable:$true] %s20_s19 }
   0x6   :  { %s301_s20 = scalar_lea.vmem %s21_s19, 256  ;;  %s305_s21 = scalar_lea.vmem %s21_s19, 512 }
   0x7   :  { %p302_p0 = scmp.ne.s32.totalorder %s21_s19, %s301_s20  ;;  %p306_p1 = scmp.lt.s32.totalorder %s21_s19, %s21_s19 }
   0x8   :  { %p307_p2 = scmp.lt.s32.totalorder %s305_s21, %s301_s20 }
   0xa   :  { %p308_p3 = por %p307_p2, %p306_p1 }
   0xc   :  { %p309_p4 = pnand %p308_p3, %p302_p0 }
   0xe   :  { %312 = shalt.err (!%p309_p4)
}
   0xf   :  { %s358_s22 = smov 256   ;;  %s359_s23 = smov 16  }
  0x10   :  { %26 = dma.hbm_to_vmem [thread:$0]  %s454_s0, 256, %s21_s19, [#allocation4], %s358_s22, %s358_s22, %s359_s23  }
  0x11   :  { %31 = vsyncadd [#allocation7], 256  ;;  %s360_s26 = smov [#allocation6]  }
  0x12   :  { %s32_s27 = sshll.u32 %s360_s26, 4  ;;  %s33_s27 = int_to_ptr.vmem [resolvable:$true] %s32_s27 }
  0x13   :  { %s321_s28 = scalar_lea.vmem %s33_s27, 256  ;;  %s325_s29 = scalar_lea.vmem %s33_s27, 512 }
  0x14   :  { %p322_p5 = scmp.ne.s32.totalorder %s33_s27, %s321_s28  ;;  %p326_p6 = scmp.lt.s32.totalorder %s33_s27, %s33_s27 }
  0x15   :  { %p327_p7 = scmp.lt.s32.totalorder %s325_s29, %s321_s28 }
  0x17   :  { %p328_p8 = por %p327_p7, %p326_p6 }
  0x19   :  { %p329_p9 = pnand %p328_p8, %p322_p5 }
  0x1b   :  { %332 = shalt.err (!%p329_p9)
}
  0x1c   :  { %38 = dma.hbm_to_vmem [thread:$0]  %s455_s1, 256, %s33_s27, [#allocation7], %s358_s22, %s358_s22, %s359_s23  }
  0x1d   :  { %349 = dma.done.wait [#allocation4], 512  }
  0x1e   :  { %350 = vsyncadd [#allocation4], 4294966784 }
  0x1f   :  { %351 = dma.done.wait [#allocation7], 512  }
  0x20   :  { %352 = vsyncadd [#allocation7], 4294966784  ;;  %v57_v0 = vld [vmem:[#allocation3] sm:$0xff]  ;;  %v58_v1 = vld [vmem:[#allocation3 + $0x8] sm:$0xff]  ;;  %v141_v11 = vlaneseq  ;;  %vm220_vm8 = vcmask 254976   ;;  %s361_s13 = smov [#allocation8]  }
  0x21   :  { %v59_v2 = vld [vmem:[#allocation3 + $0x10] sm:$0xff]  ;;  %v60_v3 = vld [vmem:[#allocation3 + $0x18] sm:$0xff]  ;;  %275 = vlog2.f32 %v57_v0  ;;  %v77_v4 = vsub.f32 0.0, %v57_v0  ;;  %v78_v5 = vsub.f32 0.0, %v58_v1  ;;  %v61_v17 = vld [vmem:[#allocation6] sm:$0xff]  ;;  %s362_s16 = smov [#allocation9]  }
  0x22   :  { %v79_v6 = vsub.f32 0.0, %v59_v2  ;;  %277 = vlog2.f32 %v58_v1  ;;  %v80_v7 = vsub.f32 0.0, %v60_v3  ;;  %v142_v14 = vshrl.u32 %v141_v11, 7  ;;  %v62_v19 = vld [vmem:[#allocation6 + $0x8] sm:$0xff]  ;;  %v409_v29 = vld [vmem:[%s457_s3] sm:$0x3] }
  0x23   :  { %279 = vlog2.f32 %v59_v2  ;;  %v81_v8 = vadd.f32 1.0, %v77_v4  ;;  %v90_v9 = vadd.f32 1.0, %v78_v5  ;;  %v84_v13 = vmul.f32 -0.5, %v77_v4  ;;  %v63_v40 = vld [vmem:[#allocation6 + $0x10] sm:$0xff]  ;;  %v64_v60 = vld [vmem:[#allocation6 + $0x18] sm:$0xff] }
  0x24   :  { %281 = vlog2.f32 %v60_v3  ;;  %v99_v10 = vadd.f32 1.0, %v79_v6  ;;  %v108_v12 = vadd.f32 1.0, %v80_v7  ;;  %v399_v15 = vand.u32 127, %v141_v11 }
  0x25   :  { %283 = vlog2.f32 %v81_v8  ;;  %v93_v16 = vmul.f32 -0.5, %v78_v5  ;;  %v102_v18 = vmul.f32 -0.5, %v79_v6  ;;  %v87_v20 = vand.u32 2147483647, %v77_v4 }
  0x26   :  { %285 = vlog2.f32 %v90_v9  ;;  %v85_v21 = vadd.f32 1.0, %v84_v13  ;;  %v111_v22 = vmul.f32 -0.5, %v80_v7  ;;  %v402_v23 = vadd.s32 128, %v399_v15 }
  0x27   :  { %287 = vlog2.f32 %v99_v10  ;;  %v404_v24 = vmul.u32 512, %v142_v14  ;;  %v94_v26 = vadd.f32 1.0, %v93_v16  ;;  %v96_v27 = vand.u32 2147483647, %v78_v5 }
  0x28   :  { %289 = vlog2.f32 %v108_v12  ;;  %v125_v28 = vsub.f32 1.0, %v61_v17  ;;  %v103_v32 = vadd.f32 1.0, %v102_v18  ;;  %v105_v33 = vand.u32 2147483647, %v79_v6 }
  0x29   :  { %v126_v34 = vsub.f32 1.0, %v62_v19  ;;  %vm411_vm0 = vcmp.lt.f32.partialorder %v87_v20, 0.0004427343  ;;  %v114_v38 = vand.u32 2147483647, %v80_v7  ;;  %v86_v42 = vmul.f32 %v85_v21, %v77_v4 }
  0x2a   :  { %v112_v43 = vadd.f32 1.0, %v111_v22  ;;  %v217_v44 = vmul.f32 1.442695, %v409_v29  ;;  %v95_v48 = vmul.f32 %v94_v26, %v78_v5  ;;  %vm416_vm1 = vcmp.lt.f32.partialorder %v96_v27, 0.0004427343 }
  0x2b   :  { %v104_v53 = vmul.f32 %v103_v32, %v79_v6  ;;  %vm420_vm2 = vcmp.lt.f32.partialorder %v105_v33, 0.0004427343  ;;  %vm424_vm3 = vcmp.lt.f32.partialorder %v114_v38, 0.0004427343  ;;  %v127_v59 = vsub.f32 1.0, %v63_v40 }
  0x2c   :  { %v113_v63 = vmul.f32 %v112_v43, %v80_v7  ;;  %291 = vpow2.f32 %v217_v44  ;;  %v128_v12 = vsub.f32 1.0, %v64_v60  ;;  %v149_v16 = vadd.s32 256, %v399_v15 }
  0x2d   :  { %v150_v18 = vadd.s32 384, %v399_v15  ;;  %v152_v26 = vadd.s32 %v404_v24, %v399_v15  ;;  %v153_v27 = vadd.s32 %v404_v24, %v402_v23 }
  0x2e   :  { %v276_v25 = vpop.eup %275  ;;  %v154_v32 = vadd.s32 %v404_v24, %v149_v16 }
  0x2f   :  { %v278_v30 = vpop.eup %277  ;;  %v66_v31 = vmul.f32 0.6931472, %v276_v25  ;;  %v155_v33 = vadd.s32 %v404_v24, %v150_v18  ;;  %vm156_vm4 = vcmp.lt.s32.totalorder %v152_v26, 2048  ;;  %vm157_vm5 = vcmp.lt.s32.totalorder %v153_v27, 2048 }
  0x30   :  { %v280_v35 = vpop.eup %279  ;;  %v68_v36 = vmul.f32 0.6931472, %v278_v30  ;;  %vm158_vm6 = vcmp.lt.s32.totalorder %v154_v32, 2048 }
  0x31   :  { %v282_v39 = vpop.eup %281  ;;  %v70_v41 = vmul.f32 0.6931472, %v280_v35  ;;  %v73_v47 = vmax.f32 %v66_v31, -100.0  ;;  %vm159_vm7 = vcmp.lt.s32.totalorder %v155_v33, 2048 }
  0x32   :  { %v284_v45 = vpop.eup %283  ;;  %v72_v46 = vmul.f32 0.6931472, %v282_v39  ;;  %v74_v51 = vmax.f32 %v68_v36, -100.0 }
  0x33   :  { %v286_v50 = vpop.eup %285  ;;  %v83_v52 = vmul.f32 0.6931472, %v284_v45  ;;  %v75_v56 = vmax.f32 %v70_v41, -100.0  ;;  %v121_v4 = vmul.f32 %v73_v47, %v61_v17 }
  0x34   :  { %v288_v55 = vpop.eup %287  ;;  %v92_v57 = vmul.f32 0.6931472, %v286_v50  ;;  %v76_v1 = vmax.f32 %v72_v46, -100.0  ;;  %v122_v9 = vmul.f32 %v74_v51, %v62_v19  ;;  %v212_v19 = vld [vmem:[%s456_s2] sm:$0x3] }
  0x35   :  { %v89_v61 = vsel %vm411_vm0, %v86_v42, %v83_v52  ;;  %v101_v62 = vmul.f32 0.6931472, %v288_v55  ;;  %v290_v0 = vpop.eup %289  ;;  %v123_v11 = vmul.f32 %v75_v56, %v63_v40  ;;  %v215_v35 = vmul.f32 %v212_v19, %v212_v19 }
  0x36   :  { %v98_v2 = vsel %vm416_vm1, %v95_v48, %v92_v57  ;;  %v117_v3 = vmax.f32 %v89_v61, -100.0  ;;  %v110_v6 = vmul.f32 0.6931472, %v290_v0  ;;  %v124_v17 = vmul.f32 %v76_v1, %v64_v60 }
  0x37   :  { %v107_v5 = vsel %vm420_vm2, %v104_v53, %v101_v62  ;;  %v118_v8 = vmax.f32 %v98_v2, -100.0 }
  0x38   :  { %v119_v10 = vmax.f32 %v107_v5, -100.0  ;;  %v129_v13 = vmul.f32 %v125_v28, %v117_v3  ;;  %v116_v7 = vsel %vm424_vm3, %v113_v63, %v110_v6 }
  0x39   :  { %v130_v14 = vmul.f32 %v126_v34, %v118_v8  ;;  %v120_v20 = vmax.f32 %v116_v7, -100.0  ;;  %v214_v34 = vadd.f32 1.0, %v409_v29  ;;  %v292_v41 = vpop.eup %291 }
  0x3a   :  { %v131_v21 = vmul.f32 %v127_v59, %v119_v10  ;;  %v133_v22 = vadd.f32 %v129_v13, %v121_v4 }
  0x3b   :  { %v134_v25 = vadd.f32 %v130_v14, %v122_v9  ;;  %v132_v28 = vmul.f32 %v128_v12, %v120_v20  ;;  %v216_v23 = vsub.f32 %v214_v34, %v215_v35 }
  0x3c   :  { %v135_v30 = vadd.f32 %v131_v21, %v123_v11  ;;  %v137_v31 = vsub.f32 0.0, %v133_v22 }
  0x3d   :  { %v136_v36 = vadd.f32 %v132_v28, %v124_v17  ;;  %v138_v37 = vsub.f32 0.0, %v134_v25  ;;  %v219_v48 = vsub.f32 %v216_v23, %v292_v41 }
  0x3e   :  { %v139_v38 = vsub.f32 0.0, %v135_v30 }
  0x3f   :  { %v140_v39 = vsub.f32 0.0, %v136_v36  ;;  %v221_v50 = vsel %vm220_vm8, %v219_v48, 0.0 }
  0x40   :  { %v164_v15 = vcombine.low %v137_v31, %v139_v38  ;;  %v165_v40 = vcombine.high %v137_v31, %v139_v38 }
  0x41   :  { %v166_v42 = vcombine.low %v138_v37, %v140_v39  ;;  %v167_v43 = vcombine.high %v138_v37, %v140_v39 }
  0x42   :  { %v172_v44 = vsel %vm156_vm4, %v164_v15, 0.0  ;;  %v173_v45 = vsel %vm157_vm5, %v165_v40, 0.0 }
  0x43   :  { %v199_v24 = vadd.f32 %v173_v45, %v172_v44  ;;  %v174_v46 = vsel %vm158_vm6, %v166_v42, 0.0  ;;  %v175_v29 = vsel %vm159_vm7, %v167_v43, 0.0 }
  0x45   :  { %v200_v47 = vadd.f32 %v199_v24, %v174_v46 }
  0x47   :  { %v201_v49 = vadd.f32 %v200_v47, %v175_v29 }
  0x49   :  { %202 = vadd.xlane.f32.xlu0 %v201_v49 }
  0x4d   :  { %222 = vadd.xlane.f32.xlu0 %v221_v50 }
  0xd2   :  { %v203_v51 = vpop.xlane.xlu0 %202 }
  0xd3   :  { %v204_v52 = vrot.slane %v203_v51, 4 }
  0xd5   :  { %v205_v53 = vadd.f32 %v204_v52, %v203_v51 }
  0xd6   :  { %v223_v54 = vpop.xlane.xlu0 %222 }
  0xd7   :  { %v206_v55 = vrot.slane %v205_v53, 2  ;;  %v224_v56 = vrot.slane %v223_v54, 4 }
  0xd9   :  { %v225_v57 = vadd.f32 %v224_v56, %v223_v54  ;;  %v207_v58 = vadd.f32 %v206_v55, %v205_v53 }
  0xdb   :  { %v226_v59 = vrot.slane %v225_v57, 2  ;;  %v208_v60 = vrot.slane %v207_v58, 1 }
  0xdd   :  { %v227_v61 = vadd.f32 %v226_v59, %v225_v57  ;;  %v209_v62 = vadd.f32 %v208_v60, %v207_v58 }
  0xdf   :  { %265 = vpush %v209_v62  ;;  %v228_v63 = vrot.slane %v227_v61, 1 }
  0xe1   :  { %v229_v0 = vadd.f32 %v228_v63, %v227_v61 }
  0xe3   :  { %267 = vpush %v229_v0 }
 0x110   :  { %s266_s2 = spop %265 }
 0x111   :  { %s211_s10 = smul.f32 0.00048828125, %s266_s2 }
 0x114   :  { %s268_s8 = spop %267 }
 0x115   :  { %s231_s9 = smul.f32 0.015625, %s268_s8 }
 0x117   :  { %s232_s11 = smul.f32 -0.5, %s231_s9 }
 0x119   :  { %s233_s12 = sadd.f32 %s232_s11, %s211_s10 }
 0x11a   :  { %237 = sst [smem:[#allocation9]] %s232_s11 }
 0x11b   :  { %235 = sst [smem:[#allocation8]] %s233_s12 }
 0x11c   :  { %245 = dma.smem_to_hbm %s361_s13, 16, %s458_s4, [#allocation5]  }
 0x11d   :  { %253 = dma.smem_to_hbm %s362_s16, 16, %s459_s5, [#allocation10]  }
 0x11e   :  { %353 = dma.done.wait [#allocation5], 16  }
 0x11f   :  { %354 = vsyncadd [#allocation5], 4294967280 }
 0x120   :  { %355 = dma.done.wait [#allocation10], 16  }
 0x121   :  { %356 = vsyncadd [#allocation10], 4294967280 }
 0x122   :  { %260 = sfence }
 0x123   :  { %261 = vsyncpa [#allocation4], 1 }
 0x124   :  { %262 = vsyncpa [#allocation7], 1 }
 0x125   :  { %263 = vsyncpa [#allocation5], 1 }
 0x126   :  { %264 = vsyncpa [#allocation10], 1 }

</bundles_post_ra>
